<compile_context>
chip_gen: v6e
topology: v6e:2x2x1
jax: 0.10.0
libtpu: 0.0.40
codegen_flags: <defaults>
</compile_context>

<pallas_src>
import jax
import jax.numpy as jnp
from jax.experimental import pallas as pl
from jax.experimental.pallas import tpu as pltpu


def _film_kernel(cond_ref, wg_ref, bg_ref, wb_ref, bb_ref, gamma_ref, beta_ref):
    """gamma = cond @ Wg + bg ; beta = cond @ Wb + bb, on one VMEM tile."""
    c = cond_ref[...]
    g = jnp.dot(c, wg_ref[...], preferred_element_type=jnp.float32)   # MXU, f32 acc
    b = jnp.dot(c, wb_ref[...], preferred_element_type=jnp.float32)   # MXU, f32 acc
    # Bias add in f32 (v5e has no bf16 VPU datapath); cast only on store.
    gamma_ref[...] = (g + bg_ref[...].astype(jnp.float32)).astype(gamma_ref.dtype)
    beta_ref[...] = (b + bb_ref[...].astype(jnp.float32)).astype(beta_ref.dtype)


def _vmem_capacity_bytes():
    try:
        return int(pltpu.get_tpu_info().vmem_capacity_bytes)
    except Exception:
        return 64 * 1024 * 1024  # conservative fallback (v7x per-TC VMEM)


def _round_up(x, m):
    return ((x + m - 1) // m) * m


def film_forward(condition, w_gamma, b_gamma, w_beta, b_beta,
                 *, batch_tile=512, feat_tile=512, out_dtype=None):
    """FiLM forward pass.

    Args:
      condition: [batch, condition_dim]
      w_gamma, w_beta: [condition_dim, feature_dim] (transposed vs. torch Linear)
      b_gamma, b_beta: [feature_dim]
      out_dtype: optional output dtype (defaults to condition.dtype)
    Returns:
      (gamma, beta): each [batch, feature_dim]
    """
    batch, cond_dim = condition.shape
    feat_dim = w_gamma.shape[1]
    out_dtype = condition.dtype if out_dtype is None else jnp.dtype(out_dtype)

    bg = b_gamma.reshape(1, feat_dim)   # tiny (F elements) per-call reshape
    bb = b_beta.reshape(1, feat_dim)

    out_shapes = (jax.ShapeDtypeStruct((batch, feat_dim), out_dtype),
                  jax.ShapeDtypeStruct((batch, feat_dim), out_dtype))

    bytes_accessed = (condition.size * condition.dtype.itemsize
                      + (w_gamma.size + w_beta.size) * w_gamma.dtype.itemsize
                      + (bg.size + bb.size) * bg.dtype.itemsize
                      + 2 * batch * feat_dim * jnp.dtype(out_dtype).itemsize)
    cost = pl.CostEstimate(flops=4 * batch * cond_dim * feat_dim,
                           transcendentals=0,
                           bytes_accessed=bytes_accessed)

    vmem_cap = _vmem_capacity_bytes()

    # ---- Small/medium problems: no grid, no pipeline, whole arrays in VMEM ----
    small_budget = min(24 << 20, vmem_cap // 3)   # v7x ~21 MiB, v5e/v6e 24 MiB
    if bytes_accessed <= small_budget:
        vmem = pltpu.MemorySpace.VMEM
        return pl.pallas_call(
            _film_kernel,
            out_shape=out_shapes,
            in_specs=[pl.BlockSpec(memory_space=vmem)] * 5,
            out_specs=(pl.BlockSpec(memory_space=vmem),
                       pl.BlockSpec(memory_space=vmem)),
            compiler_params=pltpu.CompilerParams(
                vmem_limit_bytes=min(32 << 20, vmem_cap // 2)),
            cost_estimate=cost,
        )(condition, w_gamma, bg, w_beta, bb)

    # ---- Large problems: 2-D parallel grid, edge blocks masked via cdiv -------
    batch_tile = min(batch_tile, _round_up(batch, 8))
    feat_tile = min(feat_tile, _round_up(feat_dim, 128))

    # Generation-aware VMEM budget for the double-buffered working set.
    tiled_budget = min(48 << 20, (vmem_cap * 5) // 8)   # v7x ~40 MiB, v5e/v6e 48 MiB

    def _footprint(bt, ft):
        return 2 * 4 * (bt * cond_dim            # condition tile
                        + 2 * cond_dim * ft      # w_gamma + w_beta tiles
                        + 2 * 8 * ft             # biases (sublane-padded)
                        + 2 * bt * ft)           # gamma + beta output tiles

    while _footprint(batch_tile, feat_tile) > tiled_budget and feat_tile > 256:
        feat_tile //= 2
    while _footprint(batch_tile, feat_tile) > tiled_budget and batch_tile > 256:
        batch_tile //= 2

    n_feat = pl.cdiv(feat_dim, feat_tile)
    n_batch = pl.cdiv(batch, batch_tile)

    if n_feat >= 2:
        # Feature axis OUTER: weight tiles stay resident across the inner batch
        # loop; >= 2 outer parallel steps keep both v7x TensorCores busy.
        grid = (n_feat, n_batch)
        cond_map = lambda j, i: (i, 0)
        w_map = lambda j, i: (0, j)
        b_map = lambda j, i: (0, j)
        out_map = lambda j, i: (i, j)
    else:
        # Single feature tile -> batch axis is the outer (sharded) parallel axis.
        grid = (n_batch, n_feat)
        cond_map = lambda i, j: (i, 0)
        w_map = lambda i, j: (0, j)
        b_map = lambda i, j: (0, j)
        out_map = lambda i, j: (i, j)

    return pl.pallas_call(
        _film_kernel,
        out_shape=out_shapes,
        grid=grid,
        in_specs=[
            pl.BlockSpec((batch_tile, cond_dim), cond_map),
            pl.BlockSpec((cond_dim, feat_tile), w_map),
            pl.BlockSpec((1, feat_tile), b_map),
            pl.BlockSpec((cond_dim, feat_tile), w_map),
            pl.BlockSpec((1, feat_tile), b_map),
        ],
        out_specs=(pl.BlockSpec((batch_tile, feat_tile), out_map),
                   pl.BlockSpec((batch_tile, feat_tile), out_map)),
        compiler_params=pltpu.CompilerParams(
            dimension_semantics=("parallel", "parallel"),
            vmem_limit_bytes=tiled_budget),
        cost_estimate=cost,
    )(condition, w_gamma, bg, w_beta, bb)


def _torch_linear_init(key, in_features, out_features):
    """Deterministic init mimicking nn.Linear default (uniform +/- 1/sqrt(in))."""
    kw, kb = jax.random.split(key)
    bound = 1.0 / jnp.sqrt(jnp.float32(in_features))
    # PyTorch weight is [out, in]; stored transposed [in, out] for the kernel.
    w = jax.random.uniform(kw, (in_features, out_features),
                           dtype=jnp.float32, minval=-bound, maxval=bound)
    b = jax.random.uniform(kb, (out_features,),
                           dtype=jnp.float32, minval=-bound, maxval=bound)
    return w, b


if __name__ == "__main__":
    key = jax.random.PRNGKey(0)
    k_cond, k_gamma, k_beta = jax.random.split(key, 3)

    batch = 8
    condition_dim = 32
    feature_dim = 64

    condition = jax.random.normal(k_cond, (batch, condition_dim), dtype=jnp.float32)
    w_gamma, b_gamma = _torch_linear_init(k_gamma, condition_dim, feature_dim)
    w_beta, b_beta = _torch_linear_init(k_beta, condition_dim, feature_dim)

    gamma, beta = film_forward(condition, w_gamma, b_gamma, w_beta, b_beta)
    jax.block_until_ready((gamma, beta))

    # Correctness check against plain-JAX reference of the torch semantics.
    gamma_ref = condition @ w_gamma + b_gamma
    beta_ref = condition @ w_beta + b_beta
    assert gamma.shape == (batch, feature_dim)
    assert beta.shape == (batch, feature_dim)
    assert jnp.allclose(gamma, gamma_ref, atol=1e-5, rtol=1e-5)
    assert jnp.allclose(beta, beta_ref, atol=1e-5, rtol=1e-5)

    print("KERNEL_OK")
</pallas_src>

<mosaic_0001>
module attributes {stable_mosaic.version = 11 : i64} {
  func.func @_film_kernel(%arg0: memref<8x32xf32, #tpu.memory_space<vmem>>, %arg1: memref<32x64xf32, #tpu.memory_space<vmem>>, %arg2: memref<1x64xf32, #tpu.memory_space<vmem>>, %arg3: memref<32x64xf32, #tpu.memory_space<vmem>>, %arg4: memref<1x64xf32, #tpu.memory_space<vmem>>, %arg5: memref<8x64xf32, #tpu.memory_space<vmem>>, %arg6: memref<8x64xf32, #tpu.memory_space<vmem>>) attributes {dimension_semantics = [], scalar_prefetch = 0 : i64, scratch_operands = 0 : i64, tpu.core_type = #tpu.core_type<tc>} {
    %c0 = arith.constant 0 : index
    %c0_0 = arith.constant 0 : index
    %0 = vector.load %arg0[%c0, %c0_0] : memref<8x32xf32, #tpu.memory_space<vmem>>, vector<8x32xf32>
    %c0_1 = arith.constant 0 : index
    %c0_2 = arith.constant 0 : index
    %1 = vector.load %arg1[%c0_1, %c0_2] : memref<32x64xf32, #tpu.memory_space<vmem>>, vector<32x64xf32>
    %cst = arith.constant dense<0.000000e+00> : vector<8x64xf32>
    %2 = tpu.matmul %0, %1, %cst {dimension_numbers = #tpu.dot_dimension_numbers<[1], [0], [0], [1], [0, 0, 1, 1], [], []>} : vector<8x32xf32>, vector<32x64xf32>, vector<8x64xf32> -> vector<8x64xf32>
    %c0_3 = arith.constant 0 : index
    %c0_4 = arith.constant 0 : index
    %3 = vector.load %arg3[%c0_3, %c0_4] : memref<32x64xf32, #tpu.memory_space<vmem>>, vector<32x64xf32>
    %cst_5 = arith.constant dense<0.000000e+00> : vector<8x64xf32>
    %4 = tpu.matmul %0, %3, %cst_5 {dimension_numbers = #tpu.dot_dimension_numbers<[1], [0], [0], [1], [0, 0, 1, 1], [], []>} : vector<8x32xf32>, vector<32x64xf32>, vector<8x64xf32> -> vector<8x64xf32>
    %c0_6 = arith.constant 0 : index
    %c0_7 = arith.constant 0 : index
    %5 = vector.load %arg2[%c0_6, %c0_7] : memref<1x64xf32, #tpu.memory_space<vmem>>, vector<1x64xf32>
    %6 = vector.broadcast %5 : vector<1x64xf32> to vector<8x64xf32>
    %7 = arith.addf %2, %6 : vector<8x64xf32>
    %c0_8 = arith.constant 0 : index
    %c0_9 = arith.constant 0 : index
    %8 = vector.load %arg5[%c0_8, %c0_9] : memref<8x64xf32, #tpu.memory_space<vmem>>, vector<8x64xf32>
    tpu.vector_store %arg5[%c0_8, %c0_9], %7 {strides = array<i32>} : memref<8x64xf32, #tpu.memory_space<vmem>>, vector<8x64xf32>,
    %c0_10 = arith.constant 0 : index
    %c0_11 = arith.constant 0 : index
    %9 = vector.load %arg4[%c0_10, %c0_11] : memref<1x64xf32, #tpu.memory_space<vmem>>, vector<1x64xf32>
    %10 = vector.broadcast %9 : vector<1x64xf32> to vector<8x64xf32>
    %11 = arith.addf %4, %10 : vector<8x64xf32>
    %c0_12 = arith.constant 0 : index
    %c0_13 = arith.constant 0 : index
    %12 = vector.load %arg6[%c0_12, %c0_13] : memref<8x64xf32, #tpu.memory_space<vmem>>, vector<8x64xf32>
    tpu.vector_store %arg6[%c0_12, %c0_13], %11 {strides = array<i32>} : memref<8x64xf32, #tpu.memory_space<vmem>>, vector<8x64xf32>,
    return
  }
}

</mosaic_0001>

<bundles_post_ra>
// kernel: tpu_custom_call.1
= control target key start
LH: loop header
LB: loop body
LE: loop exit
PB: predicated region body
PF: predicated region fallthrough
CT: control target
= control target key end

     0   :  { %12 = vsyncpa [#allocation3], 0  ;;  %s481_s0 = inlined_call_operand.hbm [shape: f32[8,32], index: 0, kind: input, shape index: {}]   ;;  %s482_s1 = inlined_call_operand.hbm [shape: f32[32,64], index: 1, kind: input, shape index: {}]   ;;  %s483_s2 = inlined_call_operand.vmem [shape: f32[1,64], index: 2, kind: input, shape index: {}]   ;;  %s484_s3 = inlined_call_operand.hbm [shape: f32[32,64], index: 3, kind: input, shape index: {}]   ;;  %s485_s4 = inlined_call_operand.vmem [shape: f32[1,64], index: 4, kind: input, shape index: {}]   ;;  %s486_s5 = inlined_call_operand.hbm [shape: f32[8,64], index: 5, kind: output, shape index: {0}]   ;;  %s487_s6 = inlined_call_operand.hbm [shape: f32[8,64], index: 6, kind: output, shape index: {1}]  }
   0x1   :  { %13 = vsyncpa [#allocation6], 0 }
   0x2   :  { %14 = vsyncpa [#allocation4], 0 }
   0x3   :  { %15 = vsyncpa [#allocation10], 0  ;;  %s416_s21 = smov [#allocation5]  }
   0x4   :  { %s31_s22 = sshll.u32 %s416_s21, 4  ;;  %s32_s22 = int_to_ptr.vmem [resolvable:$true] %s31_s22 }
   0x5   :  { %s316_s23 = scalar_lea.vmem %s32_s22, 512  ;;  %p321_p1 = scmp.lt.s32.totalorder %s32_s22, %s32_s22 }
   0x6   :  { %p317_p0 = scmp.ne.s32.totalorder %s32_s22, %s316_s23  ;;  %p322_p2 = scmp.lt.s32.totalorder %s316_s23, %s316_s23 }
   0x8   :  { %p323_p3 = por %p322_p2, %p321_p1 }
   0xa   :  { %p324_p4 = pnand %p323_p3, %p317_p0 }
   0xc   :  { %327 = shalt.err (!%p324_p4)
}
   0xd   :  { %s417_s24 = smov 128   ;;  %s418_s25 = smov 8  }
   0xe   :  { %37 = dma.hbm_to_vmem [thread:$0]  %s482_s1, 512, %s32_s22, [#allocation6], %s417_s24, %s417_s24, %s418_s25  }
   0xf   :  { %s419_s28 = smov [#allocation2]   ;;  %s420_s30 = smov [#allocation7]  }
  0x10   :  { %s22_s29 = sshll.u32 %s419_s28, 4  ;;  %s45_s7 = sshll.u32 %s420_s30, 4  ;;  %s23_s29 = int_to_ptr.vmem [resolvable:$true] %s22_s29  ;;  %s46_s7 = int_to_ptr.vmem [resolvable:$true] %s45_s7 }
  0x11   :  { %s336_s8 = scalar_lea.vmem %s23_s29, 128  ;;  %p341_p6 = scmp.lt.s32.totalorder %s23_s29, %s23_s29 }
  0x12   :  { %p337_p5 = scmp.ne.s32.totalorder %s23_s29, %s336_s8  ;;  %p342_p7 = scmp.lt.s32.totalorder %s336_s8, %s336_s8 }
  0x14   :  { %p343_p8 = por %p342_p7, %p341_p6 }
  0x16   :  { %p344_p9 = pnand %p343_p8, %p337_p5 }
  0x18   :  { %347 = shalt.err (!%p344_p9)
}
  0x19   :  { %25 = dma.hbm_to_vmem [thread:$0]  %s481_s0, 128, %s23_s29, [#allocation3]  }
  0x1a   :  { %s356_s11 = scalar_lea.vmem %s46_s7, 512  ;;  %p361_p11 = scmp.lt.s32.totalorder %s46_s7, %s46_s7 }
  0x1b   :  { %p357_p10 = scmp.ne.s32.totalorder %s46_s7, %s356_s11  ;;  %p362_p12 = scmp.lt.s32.totalorder %s356_s11, %s356_s11 }
  0x1d   :  { %p363_p13 = por %p362_p12, %p361_p11 }
  0x1f   :  { %p364_p0 = pnand %p363_p13, %p357_p10 }
  0x21   :  { %367 = shalt.err (!%p364_p0)
}
  0x22   :  { %51 = dma.hbm_to_vmem [thread:$0]  %s484_s3, 512, %s46_s7, [#allocation6], %s417_s24, %s417_s24, %s418_s25  }
  0x23   :  { %408 = dma.done.wait [#allocation3], 128  }
  0x24   :  { %409 = vsyncadd [#allocation3], 4294967168 }
  0x25   :  { %410 = dma.done.wait [#allocation6], 1024  }
  0x26   :  { %411 = vsyncadd [#allocation6], 4294966272  ;;  %v421_v0 = vmov 0.0   ;;  %vm422_vm0 = vmmov 0   ;;  %v67_v1 = vld [vmem:[#allocation5 + $0x18] sm:$0xff]  ;;  %v66_v3 = vld [vmem:[#allocation5 + $0x10] sm:$0xff] }
  0x27   :  { %277 = vmatprep.subr.mxu0 %v421_v0  ;;  %288 = vmatprep.subr.mxu1 %v421_v0  ;;  %v71_v2 = vld [vmem:[#allocation7 + $0x18] sm:$0xff]  ;;  %v70_v4 = vld [vmem:[#allocation7 + $0x10] sm:$0xff]  ;;  %v65_v5 = vld [vmem:[#allocation5 + $0x8] sm:$0xff]  ;;  %vm79_vm1 = vcmask 261120   ;;  %s423_s15 = smov [#allocation8]   ;;  %s424_s17 = smov [#allocation9]  }
  0x28   :  { %285 = vmatprep.mubr.msk.f32.mxu0 %vm422_vm0, %v421_v0  ;;  %296 = vmatprep.mubr.msk.f32.mxu1 %vm422_vm0, %v421_v0  ;;  %v69_v6 = vld [vmem:[#allocation7 + $0x8] sm:$0xff]  ;;  %v64_v7 = vld [vmem:[#allocation5] sm:$0xff]  ;;  %v63_v9 = vld [vmem:[#allocation2] sm:$0xff]  ;;  %s239_s16 = sshll.u32 %s423_s15, 4  ;;  %s249_s18 = sshll.u32 %s424_s17, 4  ;;  %vm153_vm2 = vcmask 523264   ;;  %s240_s16 = int_to_ptr.vmem [resolvable:$true] %s239_s16  ;;  %s250_s18 = int_to_ptr.vmem [resolvable:$true] %s249_s18 }
  0x29   :  { %278 = vmatpush3.msra.mxu0 %v67_v1  ;;  %289 = vmatpush3.msra.mxu1 %v71_v2  ;;  %v68_v8 = vld [vmem:[#allocation7] sm:$0xff]  ;;  %v263_v10 = vld [vmem:[%s483_s2] ss:$0 sm:$0xff]  ;;  %s368_s2 = scalar_lea.vmem %s240_s16, 128  ;;  %p373_p2 = scmp.lt.s32.totalorder %s240_s16, %s240_s16 }
  0x2a   :  { %279 = vmatprep.subr.mxu0 %v421_v0  ;;  %290 = vmatprep.subr.mxu1 %v421_v0  ;;  %v265_v11 = vld [vmem:[%s485_s4] ss:$0 sm:$0xff]  ;;  %p369_p1 = scmp.ne.s32.totalorder %s240_s16, %s368_s2  ;;  %p374_p3 = scmp.lt.s32.totalorder %s368_s2, %s368_s2 }
  0x2b   :  { %280 = vmatpush3.msra.mxu0 %v66_v3  ;;  %291 = vmatpush3.msra.mxu1 %v70_v4 }
  0x2c   :  { %281 = vmatprep.subr.mxu0 %v421_v0  ;;  %292 = vmatprep.subr.mxu1 %v421_v0  ;;  %p375_p4 = por %p374_p3, %p373_p2 }
  0x2d   :  { %282 = vmatpush3.msra.mxu0 %v65_v5  ;;  %293 = vmatpush3.msra.mxu1 %v69_v6 }
  0x2e   :  { %283 = vmatprep.subr.mxu0 %v421_v0  ;;  %294 = vmatprep.subr.mxu1 %v421_v0  ;;  %p376_p5 = pnand %p375_p4, %p369_p1 }
  0x2f   :  { %284 = vmatpush3.msra.mxu0 %v64_v7  ;;  %295 = vmatpush3.msra.mxu1 %v68_v8 }
  0x30   :  { %286 = vmatmul.mubr.msk.f32.vlgmr.msra.gmra.mxu0 %vm79_vm1, %v63_v9  ;;  %297 = vmatmul.mubr.msk.f32.vlgmr.msra.gmra.mxu1 %vm79_vm1, %v63_v9 }
  0xf0   :  { %v149_v12 = vpop.f32.mrf.mxu0  ;;  %v228_v13 = vpop.f32.mrf.mxu1 }
  0xf1   :  { %v150_v14 = vadd.f32 %v263_v10, %v149_v12  ;;  %v229_v15 = vadd.f32 %v265_v11, %v228_v13 }
  0xf2   :  { %v287_v16 = vpop.f32.mrf.mxu0  ;;  %v298_v17 = vpop.f32.mrf.mxu1 }
  0xf3   :  { %154 = vst.msk [vmem:[#allocation8] sm:$0xff] %vm153_vm2, %v150_v14  ;;  %232 = vst.msk [vmem:[#allocation9] sm:$0xff] %vm153_vm2, %v229_v15 }
  0xf4   :  { %379 = shalt.err (!%p376_p5)
}
  0xf5   :  { %242 = dma.vmem_to_hbm [thread:$0]  %s240_s16, 128, %s486_s5, [#allocation4]  }
  0xf6   :  { %s388_s20 = scalar_lea.vmem %s250_s18, 128  ;;  %p393_p7 = scmp.lt.s32.totalorder %s250_s18, %s250_s18 }
  0xf7   :  { %p389_p6 = scmp.ne.s32.totalorder %s250_s18, %s388_s20  ;;  %p394_p8 = scmp.lt.s32.totalorder %s388_s20, %s388_s20 }
  0xf9   :  { %p395_p9 = por %p394_p8, %p393_p7 }
  0xfb   :  { %p396_p10 = pnand %p395_p9, %p389_p6 }
  0xfd   :  { %399 = shalt.err (!%p396_p10)
}
  0xfe   :  { %252 = dma.vmem_to_hbm [thread:$0]  %s250_s18, 128, %s487_s6, [#allocation10]  }
  0xff   :  { %412 = dma.done.wait [#allocation4], 128  }
 0x100   :  { %413 = vsyncadd [#allocation4], 4294967168 }
 0x101   :  { %414 = dma.done.wait [#allocation10], 128  }
 0x102   :  { %415 = vsyncadd [#allocation10], 4294967168 }
 0x103   :  { %259 = vsyncpa [#allocation3], 1 }
 0x104   :  { %260 = vsyncpa [#allocation6], 1 }
 0x105   :  { %261 = vsyncpa [#allocation4], 1 }
 0x106   :  { %262 = vsyncpa [#allocation10], 1 }

</bundles_post_ra>
